<compile_context>
chip_gen: v5e
topology: v5e:2x2
jax: 0.10.0
libtpu: 0.0.40
codegen_flags: <defaults>
</compile_context>

<pallas_src>
import jax
import jax.numpy as jnp
from jax.experimental import pallas as pl
from jax.experimental.pallas import tpu as pltpu

VOCAB = 5
DIM = 200          # Linear(200, 200)
TILE_N_MAX = 2048  # rows per grid step (sweepable 2048-4096; 2048 is v5e-safe)


def _round_up(x, m):
    return (x + m - 1) // m * m


def _folded_embed_kernel(idx_ref, m_ref, b_ref, out_ref):
    """out = M[idx] + b, with M = E @ (Wa+Wb)^T pre-folded.

    Gather implemented as VOCAB(=5) VPU select-accumulates: bit-exact,
    no MXU pass, no one-hot construction.
    """
    idx = idx_ref[...]                                          # (tile_n, 1) int32
    acc = jnp.broadcast_to(b_ref[...], out_ref.shape).astype(jnp.float32)
    for v in range(VOCAB):                                      # unrolled, VOCAB = 5
        row = m_ref[v:v + 1, :]                                 # (1, DIM) f32
        acc = acc + jnp.where(idx == v, row, 0.0)               # (tile_n, DIM)
    out_ref[...] = acc.astype(out_ref.dtype)


@jax.jit
def model_forward(indices, emb_table, wa, ba, wb, bb):
    """indices: [B, S] int32.  Returns [B, S, DIM] float32."""
    B, S = indices.shape
    N = B * S

    # Row tiling: biggest tile up to TILE_N_MAX, but cap at ~N/2 (rounded to a
    # sublane multiple) so large inputs always give >= 2 grid programs and the
    # "parallel" axis can use both v7x TensorCores.
    half = _round_up(max(-(-N // 2), 1), 8)
    tile_n = max(8, min(TILE_N_MAX, half))
    grid = (pl.cdiv(N, tile_n),)          # ragged last block: OOB writes dropped

    idx2d = indices.reshape(N, 1).astype(jnp.int32)

    # Input-independent fold (constant-foldable under jit for fixed params):
    #   fc_a(e) + fc_b(e) = e @ (Wa+Wb)^T + (ba+bb)
    m = jnp.dot(emb_table, (wa + wb).T,
                precision=jax.lax.Precision.HIGHEST)            # (VOCAB, DIM)
    b_sum = (ba + bb).reshape(1, DIM)                           # (1, DIM)

    cost = pl.CostEstimate(
        flops=2 * N * VOCAB * DIM,
        transcendentals=0,
        bytes_accessed=N * 4 + N * DIM * 4 + VOCAB * DIM * 4 + DIM * 4,
    )

    out = pl.pallas_call(
        _folded_embed_kernel,
        out_shape=jax.ShapeDtypeStruct((N, DIM), jnp.float32),
        grid=grid,
        in_specs=[
            pl.BlockSpec((tile_n, 1), lambda i: (i, 0)),        # per-block indices
            pl.BlockSpec((VOCAB, DIM), lambda i: (0, 0)),       # folded table, VMEM-resident
            pl.BlockSpec((1, DIM), lambda i: (0, 0)),           # folded bias,  VMEM-resident
        ],
        out_specs=pl.BlockSpec((tile_n, DIM), lambda i: (i, 0)),
        compiler_params=pltpu.CompilerParams(
            dimension_semantics=("parallel",),                  # shard row-blocks across TCs
        ),
        cost_estimate=cost,
    )(idx2d, m, b_sum)

    return out.reshape(B, S, DIM)


def _reference(indices, emb_table, wa, ba, wb, bb):
    emb_x = emb_table[indices]                                  # (B, S, D)
    hi = jax.lax.Precision.HIGHEST
    ya = jnp.einsum("bsd,od->bso", emb_x, wa, precision=hi) + ba
    yb = jnp.einsum("bsd,od->bso", emb_x, wb, precision=hi) + bb
    return ya + yb


if __name__ == "__main__":
    key = jax.random.PRNGKey(0)
    k_idx, k_emb, k_wa, k_ba, k_wb, k_bb = jax.random.split(key, 6)

    B, S = 2, 8
    indices = jax.random.randint(k_idx, (B, S), 0, VOCAB, dtype=jnp.int32)

    # Deterministic synthetic parameters (shared embedding table used by both nets).
    emb_table = jax.random.normal(k_emb, (VOCAB, DIM), dtype=jnp.float32) * 0.1
    wa = jax.random.normal(k_wa, (DIM, DIM), dtype=jnp.float32) * 0.05
    ba = jax.random.normal(k_ba, (DIM,), dtype=jnp.float32) * 0.05
    wb = jax.random.normal(k_wb, (DIM, DIM), dtype=jnp.float32) * 0.05
    bb = jax.random.normal(k_bb, (DIM,), dtype=jnp.float32) * 0.05

    out = model_forward(indices, emb_table, wa, ba, wb, bb)
    out = jax.block_until_ready(out)

    ref = _reference(indices, emb_table, wa, ba, wb, bb)
    assert out.shape == (B, S, DIM), out.shape
    assert jnp.allclose(out, ref, atol=1e-4, rtol=1e-4), "mismatch vs reference"

    print("KERNEL_OK")
</pallas_src>

<mosaic_0001>
module attributes {stable_mosaic.version = 11 : i64} {
  func.func @_folded_embed_kernel(%arg0: i32, %arg1: memref<8x1xi32, #tpu.memory_space<vmem>>, %arg2: memref<5x200xf32, #tpu.memory_space<vmem>>, %arg3: memref<1x200xf32, #tpu.memory_space<vmem>>, %arg4: memref<8x200xf32, #tpu.memory_space<vmem>>) attributes {dimension_semantics = [#tpu.dimension_semantics<parallel>], iteration_bounds = array<i64: 2>, scalar_prefetch = 0 : i64, scratch_operands = 0 : i64, tpu.core_type = #tpu.core_type<tc>, window_params = [{transform_indices = @transform_0, window_bounds = array<i64: 8, 1>}, {pipeline_mode = #tpu.pipeline_mode<synchronous>, transform_indices = @transform_1, window_bounds = array<i64: 5, 200>}, {pipeline_mode = #tpu.pipeline_mode<synchronous>, transform_indices = @transform_2, window_bounds = array<i64: 1, 200>}, {transform_indices = @transform_3, window_bounds = array<i64: 8, 200>}]} {
    %c0 = arith.constant 0 : index
    %c0_0 = arith.constant 0 : index
    %0 = vector.load %arg1[%c0, %c0_0] : memref<8x1xi32, #tpu.memory_space<vmem>>, vector<8x1xi32>
    %c0_1 = arith.constant 0 : index
    %c0_2 = arith.constant 0 : index
    %1 = vector.load %arg3[%c0_1, %c0_2] : memref<1x200xf32, #tpu.memory_space<vmem>>, vector<1x200xf32>
    %2 = vector.shape_cast %1 : vector<1x200xf32> to vector<1x200xf32>
    %3 = vector.broadcast %2 : vector<1x200xf32> to vector<8x200xf32>
    %c0_3 = arith.constant 0 : index
    %c0_4 = arith.constant 0 : index
    %4 = vector.load %arg2[%c0_3, %c0_4] : memref<5x200xf32, #tpu.memory_space<vmem>>, vector<1x200xf32>
    %c0_i32 = arith.constant 0 : i32
    %5 = vector.broadcast %c0_i32 : i32 to vector<8x1xi32>
    %6 = arith.cmpi eq, %0, %5 : vector<8x1xi32>
    %cst = arith.constant 0.000000e+00 : f32
    %7 = vector.shape_cast %6 : vector<8x1xi1> to vector<8x1xi1>
    %8 = vector.broadcast %7 : vector<8x1xi1> to vector<8x200xi1>
    %9 = vector.shape_cast %4 : vector<1x200xf32> to vector<1x200xf32>
    %10 = vector.broadcast %9 : vector<1x200xf32> to vector<8x200xf32>
    %11 = vector.broadcast %cst : f32 to vector<8x200xf32>
    %12 = arith.select %8, %10, %11 : vector<8x200xi1>, vector<8x200xf32>
    %13 = arith.addf %3, %12 : vector<8x200xf32>
    %c1 = arith.constant 1 : index
    %c0_5 = arith.constant 0 : index
    %14 = vector.load %arg2[%c1, %c0_5] : memref<5x200xf32, #tpu.memory_space<vmem>>, vector<1x200xf32>
    %c1_i32 = arith.constant 1 : i32
    %15 = vector.broadcast %c1_i32 : i32 to vector<8x1xi32>
    %16 = arith.cmpi eq, %0, %15 : vector<8x1xi32>
    %cst_6 = arith.constant 0.000000e+00 : f32
    %17 = vector.shape_cast %16 : vector<8x1xi1> to vector<8x1xi1>
    %18 = vector.broadcast %17 : vector<8x1xi1> to vector<8x200xi1>
    %19 = vector.shape_cast %14 : vector<1x200xf32> to vector<1x200xf32>
    %20 = vector.broadcast %19 : vector<1x200xf32> to vector<8x200xf32>
    %21 = vector.broadcast %cst_6 : f32 to vector<8x200xf32>
    %22 = arith.select %18, %20, %21 : vector<8x200xi1>, vector<8x200xf32>
    %23 = arith.addf %13, %22 : vector<8x200xf32>
    %c2 = arith.constant 2 : index
    %c0_7 = arith.constant 0 : index
    %24 = vector.load %arg2[%c2, %c0_7] : memref<5x200xf32, #tpu.memory_space<vmem>>, vector<1x200xf32>
    %c2_i32 = arith.constant 2 : i32
    %25 = vector.broadcast %c2_i32 : i32 to vector<8x1xi32>
    %26 = arith.cmpi eq, %0, %25 : vector<8x1xi32>
    %cst_8 = arith.constant 0.000000e+00 : f32
    %27 = vector.shape_cast %26 : vector<8x1xi1> to vector<8x1xi1>
    %28 = vector.broadcast %27 : vector<8x1xi1> to vector<8x200xi1>
    %29 = vector.shape_cast %24 : vector<1x200xf32> to vector<1x200xf32>
    %30 = vector.broadcast %29 : vector<1x200xf32> to vector<8x200xf32>
    %31 = vector.broadcast %cst_8 : f32 to vector<8x200xf32>
    %32 = arith.select %28, %30, %31 : vector<8x200xi1>, vector<8x200xf32>
    %33 = arith.addf %23, %32 : vector<8x200xf32>
    %c3 = arith.constant 3 : index
    %c0_9 = arith.constant 0 : index
    %34 = vector.load %arg2[%c3, %c0_9] : memref<5x200xf32, #tpu.memory_space<vmem>>, vector<1x200xf32>
    %c3_i32 = arith.constant 3 : i32
    %35 = vector.broadcast %c3_i32 : i32 to vector<8x1xi32>
    %36 = arith.cmpi eq, %0, %35 : vector<8x1xi32>
    %cst_10 = arith.constant 0.000000e+00 : f32
    %37 = vector.shape_cast %36 : vector<8x1xi1> to vector<8x1xi1>
    %38 = vector.broadcast %37 : vector<8x1xi1> to vector<8x200xi1>
    %39 = vector.shape_cast %34 : vector<1x200xf32> to vector<1x200xf32>
    %40 = vector.broadcast %39 : vector<1x200xf32> to vector<8x200xf32>
    %41 = vector.broadcast %cst_10 : f32 to vector<8x200xf32>
    %42 = arith.select %38, %40, %41 : vector<8x200xi1>, vector<8x200xf32>
    %43 = arith.addf %33, %42 : vector<8x200xf32>
    %c4 = arith.constant 4 : index
    %c0_11 = arith.constant 0 : index
    %44 = vector.load %arg2[%c4, %c0_11] : memref<5x200xf32, #tpu.memory_space<vmem>>, vector<1x200xf32>
    %c4_i32 = arith.constant 4 : i32
    %45 = vector.broadcast %c4_i32 : i32 to vector<8x1xi32>
    %46 = arith.cmpi eq, %0, %45 : vector<8x1xi32>
    %cst_12 = arith.constant 0.000000e+00 : f32
    %47 = vector.shape_cast %46 : vector<8x1xi1> to vector<8x1xi1>
    %48 = vector.broadcast %47 : vector<8x1xi1> to vector<8x200xi1>
    %49 = vector.shape_cast %44 : vector<1x200xf32> to vector<1x200xf32>
    %50 = vector.broadcast %49 : vector<1x200xf32> to vector<8x200xf32>
    %51 = vector.broadcast %cst_12 : f32 to vector<8x200xf32>
    %52 = arith.select %48, %50, %51 : vector<8x200xi1>, vector<8x200xf32>
    %53 = arith.addf %43, %52 : vector<8x200xf32>
    %c0_13 = arith.constant 0 : index
    %c0_14 = arith.constant 0 : index
    %54 = vector.load %arg4[%c0_13, %c0_14] : memref<8x200xf32, #tpu.memory_space<vmem>>, vector<8x200xf32>
    tpu.vector_store %arg4[%c0_13, %c0_14], %53 {strides = array<i32>} : memref<8x200xf32, #tpu.memory_space<vmem>>, vector<8x200xf32>,
    return
  }
  func.func @transform_0(%arg0: i32) -> (i32, i32) {
    %c0_i32 = arith.constant 0 : i32
    %c0_i32_0 = arith.constant 0 : i32
    return %arg0, %c0_i32 : i32, i32
  }
  func.func @transform_1(%arg0: i32) -> (i32, i32) {
    %c0_i32 = arith.constant 0 : i32
    %c0_i32_0 = arith.constant 0 : i32
    %c0_i32_1 = arith.constant 0 : i32
    return %c0_i32, %c0_i32_0 : i32, i32
  }
  func.func @transform_2(%arg0: i32) -> (i32, i32) {
    %c0_i32 = arith.constant 0 : i32
    %c0_i32_0 = arith.constant 0 : i32
    %c0_i32_1 = arith.constant 0 : i32
    return %c0_i32, %c0_i32_0 : i32, i32
  }
  func.func @transform_3(%arg0: i32) -> (i32, i32) {
    %c0_i32 = arith.constant 0 : i32
    %c0_i32_0 = arith.constant 0 : i32
    return %arg0, %c0_i32 : i32, i32
  }
}

</mosaic_0001>

<bundles_post_ra>
// kernel: model_forward.1
= control target key start
LH: loop header
LB: loop body
LE: loop exit
PB: predicated region body
PF: predicated region fallthrough
CT: control target
= control target key end

     0   :  { %8 = vsyncpa [#allocation3], 0  ;;  %s587_s0 = inlined_call_operand.vmem [shape: s32[16,1], index: 0, kind: input, shape index: {}]   ;;  %s588_s1 = inlined_call_operand.vmem [shape: f32[5,200], index: 1, kind: input, shape index: {}]   ;;  %s589_s2 = inlined_call_operand.vmem [shape: f32[1,200], index: 2, kind: input, shape index: {}]   ;;  %s590_s3 = inlined_call_operand.hbm [shape: f32[16,200], index: 3, kind: output, shape index: {}]  }
   0x1   :  { %10 = vsyncpa [#allocation3 + $0x1], 0  ;;  %s480_s12 = smov 0   ;;  %s482_s13 = smov 0  }
   0x2   :  { %s484_s14 = smov 0   ;;  %s486_s15 = smov 0  }
   0x3 LB: > { %s501_s16 = sadd.s32 4294967295, %s457_s15   ;;  %s336_s17 = sadd.s32 4294967294, %s457_s15   ;;  %s457_s15 = sphi %s486_s15, %s596_s15   ;;  %s453_s14 = sphi %s484_s14, %s595_s14   ;;  %s449_s13 = sphi %s482_s13, %s594_s13   ;;  %s445_s12 = sphi %s480_s12, %s593_s12  }
   0x4   : > { %s505_s18 = sadd.s32 1, %s457_s15   ;;  %s91_s19 = sadd.s32 1, %s453_s14 }
   0x5   : > { %s88_s20 = ssub.s32 %s457_s15, %s505_s18  ;;  %p101_p0 = scmp.ne.s32.totalorder %s453_s14, %s449_s13 }
   0x6   : > { %p89_p1 = scmp.eq.s32.totalorder %s88_s20, 0  ;;  %p102_p2 = scmp.eq.s32.totalorder %s501_s16, 1 }
   0x7   : > { %p107_p3 = scmp.ne.s32.totalorder %s449_s13, %s445_s12  ;;  %p108_p4 = scmp.eq.s32.totalorder %s336_s17, 1 }
   0x8   : > { %s516_s21 = scalar_select %p89_p1, %s453_s14, %s91_s19  }
   0x9   : > { %p518_p5 = por %p102_p2, %p101_p0  ;;  %p522_p6 = por %p108_p4, %p107_p3 }
   0xa   : > { %p339_p7 = scmp.ge.s32.totalorder %s457_s15, 1  ;;  %p139_p8 = scmp.lt.s32.totalorder %s457_s15, 3 }
   0xc   : > { %p140_p9 = pnand %p339_p7, %p139_p8 }
   0xd   : > { %p162_p10 = scmp.lt.s32.totalorder (!%p140_p9), %s501_s16, 1  ;;  %s159_s17 = sand.u32 (!%p140_p9), 1, %s449_s13  }
   0xe   : > { %143 = sbr.rel (%p140_p9) target bundleno = 163 (0xa3), region = 32  ;;  %s261_s4 = scalar_lea.sflag (!%p140_p9), [#allocation3], %s159_s17 }
   0xf   : > { %s415_s9 = scalar_lea.hbm (!%p140_p9), %s590_s3, 32 }
  0x13   : > { %v459_v0 = vmov 0   ;;  %s163_s24 = scalar_select %p162_p10, %s501_s16, 1  ;;  %v173_v7 = vld [vmem:[%s588_s1] ss:$8 sm:$0x3]  ;;  %vm258_vm10 = vcmask 588800  }
  0x14   : > { %393 = vset.pattern.permute.xlu1 %v459_v0  ;;  %392 = vset.pattern.permute.xlu0 %v459_v0  ;;  %v167_v10 = vld [vmem:[%s589_s2] sm:$0x3]  ;;  %v181_v11 = vperm.slane %v173_v7, 0  ;;  %v182_v12 = vperm.slane %v173_v7, 1 }
  0x15   : > { %394 = vset.pattern.permute.xlu2 %v459_v0  ;;  %s341_s25 = sshll.u32 %s163_s24, 3  ;;  %v342_v13 = vld [vmem:[%s588_s1 + $0x1] ss:$8 sm:$0x3]  ;;  %v169_v15 = vperm.slane %v167_v10, 0  ;;  %v170_v16 = vperm.slane %v167_v10, 1 }
  0x16   : > { %s165_s28 = scalar_lea.vmem %s587_s0, %s341_s25  ;;  %v343_v14 = vld [vmem:[%s588_s1 + $0x2] ss:$8 sm:$0x3]  ;;  %v344_v17 = vld [vmem:[%s588_s1 + $0x3] ss:$8 sm:$0x3] }
  0x17   : > { %v166_v1 = vld [vmem:[%s165_s28] sm:$0xff]  ;;  %v198_v20 = vperm.slane %v342_v13, 0  ;;  %v199_v21 = vperm.slane %v342_v13, 1  ;;  %v215_v24 = vperm.slane %v343_v14, 0  ;;  %v216_v25 = vperm.slane %v343_v14, 1  ;;  %s340_s24 = sshll.u32 %s159_s17, 4 }
  0x18   : > { %vm208_vm0 = vcmp.eq.s32.totalorder %v166_v1, 2  ;;  %vm174_vm1 = vcmp.eq.s32.totalorder %v166_v1, 0  ;;  %vm242_vm2 = vcmp.eq.s32.totalorder %v166_v1, 4  ;;  %vm225_vm3 = vcmp.eq.s32.totalorder %v166_v1, 3  ;;  %s351_s25 = sshll.u32 %s501_s16, 4  ;;  %s161_s16 = scalar_lea.vmem [#allocation2], %s340_s24 }
  0x19   : > { %v209_v2 = vsel %vm208_vm0, 1, %v459_v0  ;;  %v175_v3 = vsel %vm174_vm1, 1, %v459_v0  ;;  %v243_v4 = vsel %vm242_vm2, 1, %v459_v0  ;;  %vm191_vm4 = vcmp.eq.s32.totalorder %v166_v1, 1  ;;  %s272_s28 = scalar_lea.hbm %s590_s3, %s351_s25  ;;  %s274_s29 = sshll.u32 %s161_s16, 4  ;;  %s275_s29 = int_to_ptr.vmem [resolvable:$true] %s274_s29 }
  0x1a   : > { %211 = vperm.xlu1 %393, %v209_v2   ;;  %177 = vperm.xlu0 %392, %v175_v3   ;;  %v226_v5 = vsel %vm225_vm3, 1, %v459_v0  ;;  %v192_v6 = vsel %vm191_vm4, 1, %v459_v0  ;;  %v345_v22 = vld [vmem:[%s588_s1 + $0x4] ss:$8 sm:$0x3]  ;;  %v232_v26 = vperm.slane %v344_v17, 0 }
  0x1b   : > { %245 = vperm.xlu2 %394, %v243_v4   ;;  %v233_v27 = vperm.slane %v344_v17, 1  ;;  %v249_v34 = vperm.slane %v345_v22, 0  ;;  %v250_v35 = vperm.slane %v345_v22, 1  ;;  %s276_s30 = sshll.u32 %s272_s28, 4  ;;  %s277_s30 = int_to_ptr.hbm [resolvable:$true] %s276_s30 }
  0x1c   : > { %s409_s5 = sshra.s32 %s277_s30, 4  ;;  %s410_s5 = int_to_ptr.hbm [resolvable:$true] %s409_s5 }
  0x1d   : > { %s411_s6 = scalar_lea.hbm %s410_s5, 16  ;;  %p416_p0 = scmp.lt.s32.totalorder %s410_s5, %s590_s3 }
  0x1e   : > { %p412_p11 = scmp.ne.s32.totalorder %s410_s5, %s411_s6  ;;  %p417_p1 = scmp.lt.s32.totalorder %s415_s9, %s411_s6 }
  0x20   : > { %p413_p12 = pnand %p412_p11, %p518_p5  ;;  %p418_p2 = por %p417_p1, %p416_p0 }
  0x22   : > { %228 = vperm.xlu1 %393, %v226_v5   ;;  %194 = vperm.xlu0 %392, %v192_v6   ;;  %p414_p13 = pneg %p413_p12 }
  0x24   : > { %p419_p3 = pnand %p418_p2, %p414_p13 }
  0x75   : > { %v246_v23 = vpop.permute.xlu2 %245 }
  0x76   : > { %vm247_vm9 = vcmp.eq.s32.totalorder %v246_v23, 1 }
  0x77   : > { %v253_v44 = vsel %vm247_vm9, %v249_v34, 0.0  ;;  %v254_v45 = vsel %vm247_vm9, %v250_v35, 0.0 }
  0x8c   : > { %v212_v8 = vpop.permute.xlu1 %211  ;;  %v178_v9 = vpop.permute.xlu0 %177 }
  0x8d   : > { %vm179_vm5 = vcmp.eq.s32.totalorder %v178_v9, 1  ;;  %vm213_vm6 = vcmp.eq.s32.totalorder %v212_v8, 1 }
  0x8e   : > { %v185_v18 = vsel %vm179_vm5, %v181_v11, 0.0  ;;  %v186_v19 = vsel %vm179_vm5, %v182_v12, 0.0  ;;  %v219_v38 = vsel %vm213_vm6, %v215_v24, 0.0  ;;  %v220_v39 = vsel %vm213_vm6, %v216_v25, 0.0 }
  0x8f   : > { %v187_v30 = vadd.f32 %v185_v18, %v169_v15  ;;  %v188_v31 = vadd.f32 %v186_v19, %v170_v16 }
  0x94   : > { %v229_v28 = vpop.permute.xlu1 %228  ;;  %v195_v29 = vpop.permute.xlu0 %194 }
  0x95   : > { %vm196_vm7 = vcmp.eq.s32.totalorder %v195_v29, 1  ;;  %vm230_vm8 = vcmp.eq.s32.totalorder %v229_v28, 1 }
  0x96   : > { %v202_v32 = vsel %vm196_vm7, %v198_v20, 0.0  ;;  %v203_v33 = vsel %vm196_vm7, %v199_v21, 0.0  ;;  %v236_v42 = vsel %vm230_vm8, %v232_v26, 0.0  ;;  %v237_v43 = vsel %vm230_vm8, %v233_v27, 0.0 }
  0x97   : > { %v204_v36 = vadd.f32 %v202_v32, %v187_v30  ;;  %v205_v37 = vadd.f32 %v203_v33, %v188_v31 }
  0x99   : > { %v221_v40 = vadd.f32 %v219_v38, %v204_v36  ;;  %v222_v41 = vadd.f32 %v220_v39, %v205_v37 }
  0x9b   : > { %v238_v46 = vadd.f32 %v236_v42, %v221_v40  ;;  %v239_v47 = vadd.f32 %v237_v43, %v222_v41 }
  0x9d   : > { %v255_v48 = vadd.f32 %v253_v44, %v238_v46  ;;  %v256_v49 = vadd.f32 %v254_v45, %v239_v47 }
  0x9f   : > { %257 = vst [vmem:[%s161_s16] sm:$0xff] %v255_v48 }
  0xa0   : > { %259 = vst.msk [vmem:[%s161_s16 + $0x8] sm:$0xff] %vm258_vm10, %v256_v49 }
  0xa1   : > { %422 = shalt.err (!%p419_p3)
}
  0xa2   : > { %352 = dma.vmem_to_hbm [thread:$0]  (%p518_p5), %s275_s29, 256, %s277_s30, %s261_s4  }
  0xa3 PF: > { %p358_p4 = scmp.ge.s32.totalorder %s457_s15, 2  ;;  %s288_s17 = sand.u32 1, %s445_s12  }
  0xa4   : > { %s289_s19 = scalar_lea.sflag [#allocation3], %s288_s17 }
  0xa5   : > { %p355_p7 = pnand %p358_p4, %p522_p6 }
  0xa7   : > { %p356_p8 = pneg %p355_p7 }
  0xa9   : > { %440 = dma.done.wait (%p356_p8), %s289_s19, 256  }
  0xaa   : > { %442 = vsyncadd (%p356_p8), %s289_s19, 4294967040  ;;  %p13_p9 = scmp.ge.s32.totalorder %s505_s18, 4   ;;  %s593_s12 = smov %s449_s13 }
  0xab   : > { %s594_s13 = smov %s453_s14  ;;  %s595_s14 = smov %s516_s21 }
  0xac   : > { %s596_s15 = smov %s505_s18  ;;  %15 = sbr.rel (!%p13_p9) target bundleno = 3 (0x3), region = 71 }
  0xb1   :  { %295 = vsyncpa [#allocation3], 1 }
  0xb2   :  { %297 = vsyncpa [#allocation3 + $0x1], 1 }

</bundles_post_ra>
